<compile_context>
chip_gen: v7x
topology: tpu7x:2x2x1
jax: 0.10.0
libtpu: 0.0.40
codegen_flags: <defaults>
</compile_context>

<pallas_src>
import functools

import jax
import jax.numpy as jnp
from jax import lax
from jax.experimental import pallas as pl
from jax.experimental.pallas import tpu as pltpu

NOUT_PAD = 128        # lane-dense padded class dimension
NEG_PAD = -1e30       # bias for padded classes -> softmax prob exactly 0


def birnn_ffw_kernel(xp_ref, win_ref, bin_ref, whh_ref, wtop_ref, wbot_ref, blin_ref,
                     out_ref, xw_ref, hf_ref, hb_ref, *, T, B, dim_h):
    """Fused bidirectional RNN + tanh + split-weight linear head + softmax.

    xp_ref : (T*B, 2*dim)   seq-major rows; [:, :dim] = x_t, [:, dim:] = x_{T-1-t}
    win_ref: (2*dim, 2*dim_h) block-diag [Wih_f^T | Wih_b^T]
    bin_ref: (1, 2*dim_h)     [b_f | b_b] (b_ih + b_hh per direction)
    whh_ref: (2*dim_h, 2*dim_h) block-diag [Whh_f^T | Whh_b^T]
    wtop/wbot: (dim_h, 128)   split, class-padded head weights
    blin_ref: (1, 128)        class-padded head bias (pads = NEG_PAD)
    """
    # ---- 1) hoisted input projection for BOTH directions: one big matmul, no per-step bias ----
    xw_ref[...] = (jnp.dot(xp_ref[...], win_ref[...], preferred_element_type=jnp.float32)
                   + bin_ref[...])

    # ---- 2) fused recurrence: one (B, 2H) @ (2H, 2H) matmul + one tanh per step ----
    def step(t, h_prev):
        u = xw_ref[pl.ds(t * B, B), :]                                   # (B, 2*dim_h)
        hc = jnp.tanh(u + jnp.dot(h_prev, whh_ref[...],
                                  preferred_element_type=jnp.float32))   # (B, 2*dim_h)
        # fwd half is for logical time t; bwd half is for logical time T-1-t.
        hf_ref[pl.ds(t * B, B), :] = hc[:, :dim_h]
        hb_ref[pl.ds((T - 1 - t) * B, B), :] = hc[:, dim_h:]
        return hc

    lax.fori_loop(0, T, step, jnp.zeros((B, 2 * dim_h), jnp.float32), unroll=True)

    # ---- 3) extra tanh (h = h.tanh()) + split-weight Linear + Softmax (padded, lane-dense) ----
    af = jnp.tanh(hf_ref[...])                                           # (T*B, dim_h)
    ab = jnp.tanh(hb_ref[...])                                           # (T*B, dim_h)
    logits = (jnp.dot(af, wtop_ref[...], preferred_element_type=jnp.float32)
              + jnp.dot(ab, wbot_ref[...], preferred_element_type=jnp.float32)
              + blin_ref[...])                                           # (T*B, 128)
    z = logits - jnp.max(logits, axis=-1, keepdims=True)
    e = jnp.exp(z)                                                       # padded cols -> 0
    out_ref[...] = e * pl.reciprocal(jnp.sum(e, axis=-1, keepdims=True), approx=True)


def recurrent_network_forward(x_idx_batch, params):
    """Batched forward. x_idx_batch: (B, T) int32. Returns (B, T, dim_out, 1)."""
    emb = params["emb"]
    B, T = x_idx_batch.shape
    dim = emb.shape[1]
    dim_h = params["whh_f"].shape[0]
    dim_out = params["wlin"].shape[0]

    # Embedding gather + layout glue in JAX; hot path (recurrence + head) in Pallas.
    x_emb = emb[x_idx_batch].astype(jnp.float32)                         # (B, T, dim)
    x_tm = jnp.transpose(x_emb, (1, 0, 2))                               # (T, B, dim) seq-major
    x_pair = jnp.concatenate([x_tm, x_tm[::-1]], axis=-1)                # fwd | time-reversed
    x_pair = x_pair.reshape(T * B, 2 * dim)

    # Block-diagonal input projection (both directions in one matmul) + fused biases.
    w_in = jnp.zeros((2 * dim, 2 * dim_h), jnp.float32)
    w_in = w_in.at[:dim, :dim_h].set(params["wih_f"].T)
    w_in = w_in.at[dim:, dim_h:].set(params["wih_b"].T)
    b_in = jnp.concatenate([params["bih_f"] + params["bhh_f"],
                            params["bih_b"] + params["bhh_b"]])[None, :]  # (1, 2*dim_h)

    # Block-diagonal hidden-to-hidden weight (fused fwd/bwd step).
    whh_blk = jnp.zeros((2 * dim_h, 2 * dim_h), jnp.float32)
    whh_blk = whh_blk.at[:dim_h, :dim_h].set(params["whh_f"].T)
    whh_blk = whh_blk.at[dim_h:, dim_h:].set(params["whh_b"].T)

    # Split + class-padded head (lane-dense output stores; pad bias -> prob 0).
    wlin_t = params["wlin"].T                                             # (2*dim_h, dim_out)
    wlin_top = jnp.zeros((dim_h, NOUT_PAD), jnp.float32).at[:, :dim_out].set(wlin_t[:dim_h])
    wlin_bot = jnp.zeros((dim_h, NOUT_PAD), jnp.float32).at[:, :dim_out].set(wlin_t[dim_h:])
    blin_pad = jnp.full((1, NOUT_PAD), NEG_PAD, jnp.float32).at[0, :dim_out].set(params["blin"])

    args = (x_pair, w_in, b_in, whh_blk, wlin_top, wlin_bot, blin_pad)
    kernel = functools.partial(birnn_ffw_kernel, T=T, B=B, dim_h=dim_h)

    # TODO(synk): for very long sequences, tile T with a grid + BlockSpec (and set
    # vmem_limit_bytes) to stay under v7x's 64 MiB VMEM; whole-sequence-resident is fine here.
    probs_pad = pl.pallas_call(
        kernel,
        out_shape=jax.ShapeDtypeStruct((T * B, NOUT_PAD), jnp.float32),
        in_specs=[pl.BlockSpec(memory_space=pltpu.MemorySpace.VMEM)] * len(args),
        out_specs=pl.BlockSpec(memory_space=pltpu.MemorySpace.VMEM),
        scratch_shapes=[pltpu.VMEM((T * B, 2 * dim_h), jnp.float32),   # hoisted input proj
                        pltpu.VMEM((T * B, dim_h), jnp.float32),       # fwd hidden (time order)
                        pltpu.VMEM((T * B, dim_h), jnp.float32)],      # bwd hidden (time order)
    )(*args)

    probs = probs_pad.reshape(T, B, NOUT_PAD)[:, :, :dim_out]            # (T, B, dim_out)
    probs = jnp.transpose(probs, (1, 0, 2))                              # (B, T, dim_out)
    # PyTorch per sentence: (T, 1, dim_out).transpose(1, 2) -> (T, dim_out, 1)
    return probs[:, :, :, None]                                          # (B, T, dim_out, 1)


def reference_forward(x_idx, params):
    """Pure-JAX reference for ONE sentence, mirroring the PyTorch semantics."""
    x = params["emb"][x_idx].astype(jnp.float32)
    dim_h = params["whh_f"].shape[0]

    def rnn_dir(x_seq, wih, whh, bih, bhh):
        def step(h, xt):
            h_new = jnp.tanh(xt @ wih.T + bih + h @ whh.T + bhh)
            return h_new, h_new
        _, hs = lax.scan(step, jnp.zeros((dim_h,), jnp.float32), x_seq)
        return hs

    hf = rnn_dir(x, params["wih_f"], params["whh_f"], params["bih_f"], params["bhh_f"])
    hb = rnn_dir(x[::-1], params["wih_b"], params["whh_b"],
                 params["bih_b"], params["bhh_b"])[::-1]
    h = jnp.tanh(jnp.concatenate([hf, hb], axis=-1))
    logits = h @ params["wlin"].T + params["blin"]
    p = jax.nn.softmax(logits, axis=-1)
    return p[:, :, None]


def make_params(key, dim_in, dim_out, dim, dim_h):
    ks = jax.random.split(key, 11)
    s = 0.1  # keep tanh unsaturated; deterministic synthetic init (no checkpoint load)
    return {
        "emb":   jax.random.normal(ks[0], (dim_in, dim), jnp.float32),
        "wih_f": jax.random.normal(ks[1], (dim_h, dim), jnp.float32) * s,
        "whh_f": jax.random.normal(ks[2], (dim_h, dim_h), jnp.float32) * s,
        "bih_f": jax.random.normal(ks[3], (dim_h,), jnp.float32) * s,
        "bhh_f": jax.random.normal(ks[4], (dim_h,), jnp.float32) * s,
        "wih_b": jax.random.normal(ks[5], (dim_h, dim), jnp.float32) * s,
        "whh_b": jax.random.normal(ks[6], (dim_h, dim_h), jnp.float32) * s,
        "bih_b": jax.random.normal(ks[7], (dim_h,), jnp.float32) * s,
        "bhh_b": jax.random.normal(ks[8], (dim_h,), jnp.float32) * s,
        "wlin":  jax.random.normal(ks[9], (dim_out, 2 * dim_h), jnp.float32) * s,
        "blin":  jax.random.normal(ks[10], (dim_out,), jnp.float32) * s,
    }


if __name__ == "__main__":
    # Vocabulary / corpus from the original script; whole corpus processed as one batch.
    BOS, EOS = "<BOS>", "<EOS>"
    palabras_a_indices = {"el": 0, "niño": 1, "perro": 2, "juega": 3,
                          "salta": 4, BOS: 5, EOS: 6, "UNKNOW": 7}
    corpus = [[BOS, "el", "niño", "juega"], [BOS, "el", "niño", "salta"],
              [BOS, "el", "perro", "juega"], [BOS, "el", "perro", "salta"]]
    idx = [[palabras_a_indices.get(w, palabras_a_indices["UNKNOW"]) for w in sent]
           for sent in corpus]
    x_idx = jnp.asarray(idx, dtype=jnp.int32)                            # (B, T) = (4, 4)
    B, T = x_idx.shape

    dim_in, dim_out, dim, dim_h = len(palabras_a_indices), 8, 32, 32     # small synthetic sizes
    params = make_params(jax.random.PRNGKey(0), dim_in, dim_out, dim, dim_h)

    y = recurrent_network_forward(x_idx, params)
    y = jax.block_until_ready(y)

    assert y.shape == (B, T, dim_out, 1), y.shape
    for b in range(B):
        y_ref = reference_forward(x_idx[b], params)                      # (T, dim_out, 1)
        assert jnp.allclose(y[b], y_ref, atol=2e-3, rtol=2e-3), f"mismatch on sentence {b}"

    print("KERNEL_OK")
</pallas_src>

<mosaic_0001>
module attributes {stable_mosaic.version = 11 : i64} {
  func.func @birnn_ffw_kernel(%arg0: memref<16x64xf32, #tpu.memory_space<vmem>>, %arg1: memref<64x64xf32, #tpu.memory_space<vmem>>, %arg2: memref<1x64xf32, #tpu.memory_space<vmem>>, %arg3: memref<64x64xf32, #tpu.memory_space<vmem>>, %arg4: memref<32x128xf32, #tpu.memory_space<vmem>>, %arg5: memref<32x128xf32, #tpu.memory_space<vmem>>, %arg6: memref<1x128xf32, #tpu.memory_space<vmem>>, %arg7: memref<16x128xf32, #tpu.memory_space<vmem>>, %arg8: memref<16x64xf32, #tpu.memory_space<vmem>>, %arg9: memref<16x32xf32, #tpu.memory_space<vmem>>, %arg10: memref<16x32xf32, #tpu.memory_space<vmem>>) attributes {dimension_semantics = [], scalar_prefetch = 0 : i64, scratch_operands = 3 : i64, tpu.core_type = #tpu.core_type<tc>} {
    %c0 = arith.constant 0 : index
    %c0_0 = arith.constant 0 : index
    %0 = vector.load %arg0[%c0, %c0_0] : memref<16x64xf32, #tpu.memory_space<vmem>>, vector<16x64xf32>
    %c0_1 = arith.constant 0 : index
    %c0_2 = arith.constant 0 : index
    %1 = vector.load %arg1[%c0_1, %c0_2] : memref<64x64xf32, #tpu.memory_space<vmem>>, vector<64x64xf32>
    %cst = arith.constant dense<0.000000e+00> : vector<16x64xf32>
    %2 = tpu.matmul %0, %1, %cst {dimension_numbers = #tpu.dot_dimension_numbers<[1], [0], [0], [1], [0, 0, 1, 1], [], []>} : vector<16x64xf32>, vector<64x64xf32>, vector<16x64xf32> -> vector<16x64xf32>
    %c0_3 = arith.constant 0 : index
    %c0_4 = arith.constant 0 : index
    %3 = vector.load %arg2[%c0_3, %c0_4] : memref<1x64xf32, #tpu.memory_space<vmem>>, vector<1x64xf32>
    %4 = vector.broadcast %3 : vector<1x64xf32> to vector<16x64xf32>
    %5 = arith.addf %2, %4 : vector<16x64xf32>
    %c0_5 = arith.constant 0 : index
    %c0_6 = arith.constant 0 : index
    %6 = vector.load %arg8[%c0_5, %c0_6] : memref<16x64xf32, #tpu.memory_space<vmem>>, vector<16x64xf32>
    tpu.vector_store %arg8[%c0_5, %c0_6], %5 {strides = array<i32>} : memref<16x64xf32, #tpu.memory_space<vmem>>, vector<16x64xf32>,
    %cst_7 = arith.constant 0.000000e+00 : f32
    %7 = vector.broadcast %cst_7 : f32 to vector<4x64xf32>
    %c0_i32 = arith.constant 0 : i32
    %c4_i32 = arith.constant 4 : i32
    %8 = arith.muli %c0_i32, %c4_i32 : i32
    %9 = arith.index_cast %8 : i32 to index
    %c0_8 = arith.constant 0 : index
    %10 = vector.load %arg8[%9, %c0_8] : memref<16x64xf32, #tpu.memory_space<vmem>>, vector<4x64xf32>
    %c0_9 = arith.constant 0 : index
    %c0_10 = arith.constant 0 : index
    %11 = vector.load %arg3[%c0_9, %c0_10] : memref<64x64xf32, #tpu.memory_space<vmem>>, vector<64x64xf32>
    %cst_11 = arith.constant dense<0.000000e+00> : vector<4x64xf32>
    %12 = tpu.matmul %7, %11, %cst_11 {dimension_numbers = #tpu.dot_dimension_numbers<[1], [0], [0], [1], [0, 0, 1, 1], [], []>} : vector<4x64xf32>, vector<64x64xf32>, vector<4x64xf32> -> vector<4x64xf32>
    %13 = arith.addf %10, %12 : vector<4x64xf32>
    %14 = math.tanh %13 : vector<4x64xf32>
    %15 = vector.extract_strided_slice %14 {offsets = [0, 0], sizes = [4, 32], strides = [1, 1]} : vector<4x64xf32> to vector<4x32xf32>
    %c4_i32_12 = arith.constant 4 : i32
    %16 = arith.muli %c0_i32, %c4_i32_12 : i32
    %17 = arith.index_cast %16 : i32 to index
    %c0_13 = arith.constant 0 : index
    %18 = vector.load %arg9[%17, %c0_13] : memref<16x32xf32, #tpu.memory_space<vmem>>, vector<4x32xf32>
    tpu.vector_store %arg9[%17, %c0_13], %15 {strides = array<i32>} : memref<16x32xf32, #tpu.memory_space<vmem>>, vector<4x32xf32>,
    %19 = vector.extract_strided_slice %14 {offsets = [0, 32], sizes = [4, 32], strides = [1, 1]} : vector<4x64xf32> to vector<4x32xf32>
    %c3_i32 = arith.constant 3 : i32
    %20 = arith.subi %c3_i32, %c0_i32 : i32
    %c4_i32_14 = arith.constant 4 : i32
    %21 = arith.muli %20, %c4_i32_14 : i32
    %22 = arith.index_cast %21 : i32 to index
    %c0_15 = arith.constant 0 : index
    %23 = vector.load %arg10[%22, %c0_15] : memref<16x32xf32, #tpu.memory_space<vmem>>, vector<4x32xf32>
    tpu.vector_store %arg10[%22, %c0_15], %19 {strides = array<i32>} : memref<16x32xf32, #tpu.memory_space<vmem>>, vector<4x32xf32>,
    %c1_i32 = arith.constant 1 : i32
    %c4_i32_16 = arith.constant 4 : i32
    %24 = arith.muli %c1_i32, %c4_i32_16 : i32
    %25 = arith.index_cast %24 : i32 to index
    %c0_17 = arith.constant 0 : index
    %26 = vector.load %arg8[%25, %c0_17] : memref<16x64xf32, #tpu.memory_space<vmem>>, vector<4x64xf32>
    %c0_18 = arith.constant 0 : index
    %c0_19 = arith.constant 0 : index
    %27 = vector.load %arg3[%c0_18, %c0_19] : memref<64x64xf32, #tpu.memory_space<vmem>>, vector<64x64xf32>
    %cst_20 = arith.constant dense<0.000000e+00> : vector<4x64xf32>
    %28 = tpu.matmul %14, %27, %cst_20 {dimension_numbers = #tpu.dot_dimension_numbers<[1], [0], [0], [1], [0, 0, 1, 1], [], []>} : vector<4x64xf32>, vector<64x64xf32>, vector<4x64xf32> -> vector<4x64xf32>
    %29 = arith.addf %26, %28 : vector<4x64xf32>
    %30 = math.tanh %29 : vector<4x64xf32>
    %31 = vector.extract_strided_slice %30 {offsets = [0, 0], sizes = [4, 32], strides = [1, 1]} : vector<4x64xf32> to vector<4x32xf32>
    %c4_i32_21 = arith.constant 4 : i32
    %32 = arith.muli %c1_i32, %c4_i32_21 : i32
    %33 = arith.index_cast %32 : i32 to index
    %c0_22 = arith.constant 0 : index
    %34 = vector.load %arg9[%33, %c0_22] : memref<16x32xf32, #tpu.memory_space<vmem>>, vector<4x32xf32>
    tpu.vector_store %arg9[%33, %c0_22], %31 {strides = array<i32>} : memref<16x32xf32, #tpu.memory_space<vmem>>, vector<4x32xf32>,
    %35 = vector.extract_strided_slice %30 {offsets = [0, 32], sizes = [4, 32], strides = [1, 1]} : vector<4x64xf32> to vector<4x32xf32>
    %c3_i32_23 = arith.constant 3 : i32
    %36 = arith.subi %c3_i32_23, %c1_i32 : i32
    %c4_i32_24 = arith.constant 4 : i32
    %37 = arith.muli %36, %c4_i32_24 : i32
    %38 = arith.index_cast %37 : i32 to index
    %c0_25 = arith.constant 0 : index
    %39 = vector.load %arg10[%38, %c0_25] : memref<16x32xf32, #tpu.memory_space<vmem>>, vector<4x32xf32>
    tpu.vector_store %arg10[%38, %c0_25], %35 {strides = array<i32>} : memref<16x32xf32, #tpu.memory_space<vmem>>, vector<4x32xf32>,
    %c2_i32 = arith.constant 2 : i32
    %c4_i32_26 = arith.constant 4 : i32
    %40 = arith.muli %c2_i32, %c4_i32_26 : i32
    %41 = arith.index_cast %40 : i32 to index
    %c0_27 = arith.constant 0 : index
    %42 = vector.load %arg8[%41, %c0_27] : memref<16x64xf32, #tpu.memory_space<vmem>>, vector<4x64xf32>
    %c0_28 = arith.constant 0 : index
    %c0_29 = arith.constant 0 : index
    %43 = vector.load %arg3[%c0_28, %c0_29] : memref<64x64xf32, #tpu.memory_space<vmem>>, vector<64x64xf32>
    %cst_30 = arith.constant dense<0.000000e+00> : vector<4x64xf32>
    %44 = tpu.matmul %30, %43, %cst_30 {dimension_numbers = #tpu.dot_dimension_numbers<[1], [0], [0], [1], [0, 0, 1, 1], [], []>} : vector<4x64xf32>, vector<64x64xf32>, vector<4x64xf32> -> vector<4x64xf32>
    %45 = arith.addf %42, %44 : vector<4x64xf32>
    %46 = math.tanh %45 : vector<4x64xf32>
    %47 = vector.extract_strided_slice %46 {offsets = [0, 0], sizes = [4, 32], strides = [1, 1]} : vector<4x64xf32> to vector<4x32xf32>
    %c4_i32_31 = arith.constant 4 : i32
    %48 = arith.muli %c2_i32, %c4_i32_31 : i32
    %49 = arith.index_cast %48 : i32 to index
    %c0_32 = arith.constant 0 : index
    %50 = vector.load %arg9[%49, %c0_32] : memref<16x32xf32, #tpu.memory_space<vmem>>, vector<4x32xf32>
    tpu.vector_store %arg9[%49, %c0_32], %47 {strides = array<i32>} : memref<16x32xf32, #tpu.memory_space<vmem>>, vector<4x32xf32>,
    %51 = vector.extract_strided_slice %46 {offsets = [0, 32], sizes = [4, 32], strides = [1, 1]} : vector<4x64xf32> to vector<4x32xf32>
    %c3_i32_33 = arith.constant 3 : i32
    %52 = arith.subi %c3_i32_33, %c2_i32 : i32
    %c4_i32_34 = arith.constant 4 : i32
    %53 = arith.muli %52, %c4_i32_34 : i32
    %54 = arith.index_cast %53 : i32 to index
    %c0_35 = arith.constant 0 : index
    %55 = vector.load %arg10[%54, %c0_35] : memref<16x32xf32, #tpu.memory_space<vmem>>, vector<4x32xf32>
    tpu.vector_store %arg10[%54, %c0_35], %51 {strides = array<i32>} : memref<16x32xf32, #tpu.memory_space<vmem>>, vector<4x32xf32>,
    %c3_i32_36 = arith.constant 3 : i32
    %c4_i32_37 = arith.constant 4 : i32
    %56 = arith.muli %c3_i32_36, %c4_i32_37 : i32
    %57 = arith.index_cast %56 : i32 to index
    %c0_38 = arith.constant 0 : index
    %58 = vector.load %arg8[%57, %c0_38] : memref<16x64xf32, #tpu.memory_space<vmem>>, vector<4x64xf32>
    %c0_39 = arith.constant 0 : index
    %c0_40 = arith.constant 0 : index
    %59 = vector.load %arg3[%c0_39, %c0_40] : memref<64x64xf32, #tpu.memory_space<vmem>>, vector<64x64xf32>
    %cst_41 = arith.constant dense<0.000000e+00> : vector<4x64xf32>
    %60 = tpu.matmul %46, %59, %cst_41 {dimension_numbers = #tpu.dot_dimension_numbers<[1], [0], [0], [1], [0, 0, 1, 1], [], []>} : vector<4x64xf32>, vector<64x64xf32>, vector<4x64xf32> -> vector<4x64xf32>
    %61 = arith.addf %58, %60 : vector<4x64xf32>
    %62 = math.tanh %61 : vector<4x64xf32>
    %63 = vector.extract_strided_slice %62 {offsets = [0, 0], sizes = [4, 32], strides = [1, 1]} : vector<4x64xf32> to vector<4x32xf32>
    %c4_i32_42 = arith.constant 4 : i32
    %64 = arith.muli %c3_i32_36, %c4_i32_42 : i32
    %65 = arith.index_cast %64 : i32 to index
    %c0_43 = arith.constant 0 : index
    %66 = vector.load %arg9[%65, %c0_43] : memref<16x32xf32, #tpu.memory_space<vmem>>, vector<4x32xf32>
    tpu.vector_store %arg9[%65, %c0_43], %63 {strides = array<i32>} : memref<16x32xf32, #tpu.memory_space<vmem>>, vector<4x32xf32>,
    %67 = vector.extract_strided_slice %62 {offsets = [0, 32], sizes = [4, 32], strides = [1, 1]} : vector<4x64xf32> to vector<4x32xf32>
    %c3_i32_44 = arith.constant 3 : i32
    %68 = arith.subi %c3_i32_44, %c3_i32_36 : i32
    %c4_i32_45 = arith.constant 4 : i32
    %69 = arith.muli %68, %c4_i32_45 : i32
    %70 = arith.index_cast %69 : i32 to index
    %c0_46 = arith.constant 0 : index
    %71 = vector.load %arg10[%70, %c0_46] : memref<16x32xf32, #tpu.memory_space<vmem>>, vector<4x32xf32>
    tpu.vector_store %arg10[%70, %c0_46], %67 {strides = array<i32>} : memref<16x32xf32, #tpu.memory_space<vmem>>, vector<4x32xf32>,
    %c4_i32_47 = arith.constant 4 : i32
    %c0_48 = arith.constant 0 : index
    %c0_49 = arith.constant 0 : index
    %72 = vector.load %arg9[%c0_48, %c0_49] : memref<16x32xf32, #tpu.memory_space<vmem>>, vector<16x32xf32>
    %73 = math.tanh %72 : vector<16x32xf32>
    %c0_50 = arith.constant 0 : index
    %c0_51 = arith.constant 0 : index
    %74 = vector.load %arg10[%c0_50, %c0_51] : memref<16x32xf32, #tpu.memory_space<vmem>>, vector<16x32xf32>
    %75 = math.tanh %74 : vector<16x32xf32>
    %c0_52 = arith.constant 0 : index
    %c0_53 = arith.constant 0 : index
    %76 = vector.load %arg4[%c0_52, %c0_53] : memref<32x128xf32, #tpu.memory_space<vmem>>, vector<32x128xf32>
    %cst_54 = arith.constant dense<0.000000e+00> : vector<16x128xf32>
    %77 = tpu.matmul %73, %76, %cst_54 {dimension_numbers = #tpu.dot_dimension_numbers<[1], [0], [0], [1], [0, 0, 1, 1], [], []>} : vector<16x32xf32>, vector<32x128xf32>, vector<16x128xf32> -> vector<16x128xf32>
    %c0_55 = arith.constant 0 : index
    %c0_56 = arith.constant 0 : index
    %78 = vector.load %arg5[%c0_55, %c0_56] : memref<32x128xf32, #tpu.memory_space<vmem>>, vector<32x128xf32>
    %cst_57 = arith.constant dense<0.000000e+00> : vector<16x128xf32>
    %79 = tpu.matmul %75, %78, %cst_57 {dimension_numbers = #tpu.dot_dimension_numbers<[1], [0], [0], [1], [0, 0, 1, 1], [], []>} : vector<16x32xf32>, vector<32x128xf32>, vector<16x128xf32> -> vector<16x128xf32>
    %80 = arith.addf %77, %79 : vector<16x128xf32>
    %c0_58 = arith.constant 0 : index
    %c0_59 = arith.constant 0 : index
    %81 = vector.load %arg6[%c0_58, %c0_59] : memref<1x128xf32, #tpu.memory_space<vmem>>, vector<1x128xf32>
    %82 = vector.broadcast %81 : vector<1x128xf32> to vector<16x128xf32>
    %83 = arith.addf %80, %82 : vector<16x128xf32>
    %cst_60 = arith.constant dense<0xFF800000> : vector<16xf32>
    %84 = vector.multi_reduction <maximumf>, %83, %cst_60 [1] : vector<16x128xf32> to vector<16xf32>
    %85 = vector.shape_cast %84 : vector<16xf32> to vector<16x1xf32>
    %86 = vector.broadcast %85 : vector<16x1xf32> to vector<16x128xf32>
    %87 = arith.subf %83, %86 : vector<16x128xf32>
    %88 = math.exp %87 : vector<16x128xf32>
    %cst_61 = arith.constant dense<0.000000e+00> : vector<16xf32>
    %89 = vector.multi_reduction <add>, %88, %cst_61 [1] : vector<16x128xf32> to vector<16xf32>
    %90 = vector.shape_cast %89 : vector<16xf32> to vector<16x1xf32>
    %91 = tpu.reciprocal %90 {approx = true} : vector<16x1xf32> -> vector<16x1xf32>
    %92 = vector.broadcast %91 : vector<16x1xf32> to vector<16x128xf32>
    %93 = arith.mulf %88, %92 : vector<16x128xf32>
    %c0_62 = arith.constant 0 : index
    %c0_63 = arith.constant 0 : index
    %94 = vector.load %arg7[%c0_62, %c0_63] : memref<16x128xf32, #tpu.memory_space<vmem>>, vector<16x128xf32>
    tpu.vector_store %arg7[%c0_62, %c0_63], %93 {strides = array<i32>} : memref<16x128xf32, #tpu.memory_space<vmem>>, vector<16x128xf32>,
    return
  }
}

</mosaic_0001>

<bundles_post_ra>
// kernel: tpu_custom_call.1
= control target key start
LH: loop header
LB: loop body
LE: loop exit
PB: predicated region body
PF: predicated region fallthrough
CT: control target
= control target key end

     0   :  { %12 = vsyncpa [#allocation6], 0  ;;  %s1437_s0 = inlined_call_operand.hbm [shape: f32[16,64], index: 0, kind: input, shape index: {}]   ;;  %s1438_s1 = inlined_call_operand.hbm [shape: f32[64,64], index: 1, kind: input, shape index: {}]   ;;  %s1439_s2 = inlined_call_operand.vmem [shape: f32[1,64], index: 2, kind: input, shape index: {}]   ;;  %s1440_s3 = inlined_call_operand.hbm [shape: f32[64,64], index: 3, kind: input, shape index: {}]   ;;  %s1441_s4 = inlined_call_operand.hbm [shape: f32[32,128], index: 4, kind: input, shape index: {}]   ;;  %s1442_s5 = inlined_call_operand.hbm [shape: f32[32,128], index: 5, kind: input, shape index: {}]   ;;  %s1443_s6 = inlined_call_operand.vmem [shape: f32[1,128], index: 6, kind: input, shape index: {}]   ;;  %s1444_s7 = inlined_call_operand.hbm [shape: f32[16,128], index: 7, kind: output, shape index: {}]  }
   0x1   :  { %13 = vsyncpa [#allocation9], 0 }
   0x2   :  { %14 = vsyncpa [#allocation12], 0 }
   0x3   :  { %15 = vsyncpa [#allocation7], 0  ;;  %s1225_s24 = smov [#allocation8]   ;;  %s1226_s26 = smov [#allocation11]  }
   0x4   :  { %s33_s25 = sshll.u32 %s1225_s24, 4  ;;  %s59_s27 = sshll.u32 %s1226_s26, 4  ;;  %s34_s25 = int_to_ptr.vmem [resolvable:$true] %s33_s25  ;;  %s1277_s27 = int_to_ptr.vmem [resolvable:$true] %s59_s27 }
   0x5   :  { %s1085_s30 = scalar_lea.hbm %s1438_s1, 1024 }
   0x6   :  { %p1086_p0 = scmp.ne.s32.totalorder %s1438_s1, %s1085_s30  ;;  %p1089_p1 = scmp.lt.u32.totalorder %s1085_s30, %s1438_s1 }
   0x8   :  { %p1091_p2 = pnand %p1089_p1, %p1086_p0 }
   0xa   :  { %1094 = shalt.err (!%p1091_p2)
}
   0xb   :  { %s1095_s12 = scalar_lea.vmem %s34_s25, 1024  ;;  %p1100_p4 = scmp.lt.s32.totalorder %s34_s25, %s34_s25 }
   0xc   :  { %p1096_p3 = scmp.ne.s32.totalorder %s34_s25, %s1095_s12  ;;  %p1101_p5 = scmp.lt.s32.totalorder %s1095_s12, %s1095_s12 }
   0xe   :  { %p1102_p6 = por %p1101_p5, %p1100_p4 }
  0x10   :  { %p1103_p7 = pnand %p1102_p6, %p1096_p3 }
  0x12   :  { %1106 = shalt.err (!%p1103_p7)
}
  0x13   :  { %s1227_s13 = smov 128   ;;  %s1228_s14 = smov 8  }
  0x14   :  { %39 = dma.hbm_to_vmem [thread:$0]  %s1438_s1, 1024, %s34_s25, [#allocation9], %s1227_s13, %s1227_s13, %s1228_s14  }
  0x15   :  { %s1107_s19 = scalar_lea.hbm %s1441_s4, 512 }
  0x16   :  { %p1108_p8 = scmp.ne.s32.totalorder %s1441_s4, %s1107_s19  ;;  %p1111_p9 = scmp.lt.u32.totalorder %s1107_s19, %s1441_s4 }
  0x18   :  { %p1113_p10 = pnand %p1111_p9, %p1108_p8 }
  0x1a   :  { %1116 = shalt.err (!%p1113_p10)
}
  0x1b   :  { %s1117_s24 = scalar_lea.vmem %s1277_s27, 512  ;;  %p1122_p12 = scmp.lt.s32.totalorder %s1277_s27, %s1277_s27 }
  0x1c   :  { %p1118_p11 = scmp.ne.s32.totalorder %s1277_s27, %s1117_s24  ;;  %p1123_p13 = scmp.lt.s32.totalorder %s1117_s24, %s1117_s24 }
  0x1e   :  { %p1124_p0 = por %p1123_p13, %p1122_p12 }
  0x20   :  { %p1125_p1 = pnand %p1124_p0, %p1118_p11 }
  0x22   :  { %1128 = shalt.err (!%p1125_p1)
}
  0x23   :  { %65 = dma.hbm_to_vmem [thread:$0]  %s1441_s4, 512, %s1277_s27, [#allocation12], %s1227_s13, %s1227_s13, %s1228_s14  }
  0x24   :  { %s1229_s26 = smov [#allocation5]   ;;  %s1230_s29 = smov [#allocation10]  }
  0x25   :  { %s21_s28 = sshll.u32 %s1229_s26, 4  ;;  %s47_s30 = sshll.u32 %s1230_s29, 4  ;;  %s22_s28 = int_to_ptr.vmem [resolvable:$true] %s21_s28  ;;  %s1314_s30 = int_to_ptr.vmem [resolvable:$true] %s47_s30 }
  0x26   :  { %s1129_s10 = scalar_lea.hbm %s1437_s0, 256 }
  0x27   :  { %p1130_p2 = scmp.ne.s32.totalorder %s1437_s0, %s1129_s10  ;;  %p1133_p3 = scmp.lt.u32.totalorder %s1129_s10, %s1437_s0 }
  0x29   :  { %p1135_p4 = pnand %p1133_p3, %p1130_p2 }
  0x2b   :  { %1138 = shalt.err (!%p1135_p4)
}
  0x2c   :  { %s1139_s4 = scalar_lea.vmem %s22_s28, 256  ;;  %p1144_p6 = scmp.lt.s32.totalorder %s22_s28, %s22_s28 }
  0x2d   :  { %p1140_p5 = scmp.ne.s32.totalorder %s22_s28, %s1139_s4  ;;  %p1145_p7 = scmp.lt.s32.totalorder %s1139_s4, %s1139_s4 }
  0x2f   :  { %p1146_p8 = por %p1145_p7, %p1144_p6 }
  0x31   :  { %p1147_p9 = pnand %p1146_p8, %p1140_p5 }
  0x33   :  { %1150 = shalt.err (!%p1147_p9)
}
  0x34   :  { %27 = dma.hbm_to_vmem [thread:$0]  %s1437_s0, 256, %s22_s28, [#allocation6], %s1227_s13, %s1227_s13, %s1228_s14  }
  0x35   :  { %s1151_s20 = scalar_lea.hbm %s1440_s3, 1024 }
  0x36   :  { %p1152_p10 = scmp.ne.s32.totalorder %s1440_s3, %s1151_s20  ;;  %p1155_p11 = scmp.lt.u32.totalorder %s1151_s20, %s1440_s3 }
  0x38   :  { %p1157_p12 = pnand %p1155_p11, %p1152_p10 }
  0x3a   :  { %1160 = shalt.err (!%p1157_p12)
}
  0x3b   :  { %s1161_s1 = scalar_lea.vmem %s1314_s30, 1024  ;;  %p1166_p0 = scmp.lt.s32.totalorder %s1314_s30, %s1314_s30 }
  0x3c   :  { %p1162_p13 = scmp.ne.s32.totalorder %s1314_s30, %s1161_s1  ;;  %p1167_p1 = scmp.lt.s32.totalorder %s1161_s1, %s1161_s1 }
  0x3e   :  { %p1168_p2 = por %p1167_p1, %p1166_p0 }
  0x40   :  { %p1169_p3 = pnand %p1168_p2, %p1162_p13 }
  0x42   :  { %1172 = shalt.err (!%p1169_p3)
}
  0x43   :  { %53 = dma.hbm_to_vmem [thread:$0]  %s1440_s3, 1024, %s1314_s30, [#allocation9], %s1227_s13, %s1227_s13, %s1228_s14  }
  0x44   :  { %s1231_s26 = smov [#allocation13]   ;;  %s1173_s9 = scalar_lea.hbm %s1442_s5, 512 }
  0x45   :  { %s71_s28 = sshll.u32 %s1231_s26, 4  ;;  %p1174_p4 = scmp.ne.s32.totalorder %s1442_s5, %s1173_s9  ;;  %s72_s28 = int_to_ptr.vmem [resolvable:$true] %s71_s28 }
  0x46   :  { %p1177_p5 = scmp.lt.u32.totalorder %s1173_s9, %s1442_s5 }
  0x48   :  { %p1179_p6 = pnand %p1177_p5, %p1174_p4 }
  0x4a   :  { %1182 = shalt.err (!%p1179_p6)
}
  0x4b   :  { %s1183_s16 = scalar_lea.vmem %s72_s28, 512  ;;  %p1188_p8 = scmp.lt.s32.totalorder %s72_s28, %s72_s28 }
  0x4c   :  { %p1184_p7 = scmp.ne.s32.totalorder %s72_s28, %s1183_s16  ;;  %p1189_p9 = scmp.lt.s32.totalorder %s1183_s16, %s1183_s16 }
  0x4e   :  { %p1190_p10 = por %p1189_p9, %p1188_p8 }
  0x50   :  { %p1191_p11 = pnand %p1190_p10, %p1184_p7 }
  0x52   :  { %1194 = shalt.err (!%p1191_p11)
}
  0x53   :  { %77 = dma.hbm_to_vmem [thread:$0]  %s1442_s5, 512, %s72_s28, [#allocation12], %s1227_s13, %s1227_s13, %s1228_s14  }
  0x54   :  { %1217 = dma.done.wait [#allocation6], 256  }
  0x55   :  { %1218 = vsyncadd [#allocation6], 4294967040 }
  0x56   :  { %1219 = dma.done.wait [#allocation9], 2048  }
  0x57   :  { %1220 = vsyncadd [#allocation9], 4294965248 }
  0x58   :  { %1221 = dma.done.wait [#allocation12], 1024  }
  0x59   :  { %1222 = vsyncadd [#allocation12], 4294966272  ;;  %v1232_v0 = vmov 0.0|0.0   ;;  %vm1233_vm0 = vmmov 0   ;;  %v1234_v1 = vmov 0.0   ;;  %v97_v2 = vld [vmem:[#allocation8] sm:$0xff] }
  0x5a   :  { %983 = vmatprep.subr.bf16.mxu1 %v1232_v0  ;;  %885 = vmatprep.mubr.msk.f32.mxu1 %vm1233_vm0, %v1234_v1  ;;  %v98_v3 = vld [vmem:[#allocation8 + $0x8] sm:$0xff]  ;;  %v99_v4 = vld [vmem:[#allocation8 + $0x10] sm:$0xff]  ;;  %v100_v6 = vld [vmem:[#allocation8 + $0x18] sm:$0xff]  ;;  %vm112_vm1 = vcmask 523264   ;;  %vm280_vm2 = vcmask 257024   ;;  %s1235_s27 = smov 96  }
  0x5b   :  { %v967_v5 = vpack.c.bf16 %v98_v3, %v97_v2  ;;  %v101_v7 = vld [vmem:[#allocation8 + $0x20] sm:$0xff]  ;;  %v971_v8 = vpack.c.bf16 %v100_v6, %v99_v4  ;;  %v102_v9 = vld [vmem:[#allocation8 + $0x28] sm:$0xff]  ;;  %v95_v13 = vld [vmem:[#allocation5] sm:$0xff]  ;;  %vm570_vm3 = vcmask 261120  }
  0x5c   :  { %v197_v10 = vld [vmem:[#allocation10] sm:$0xff]  ;;  %v198_v11 = vld [vmem:[#allocation10 + $0x8] sm:$0xff]  ;;  %v199_v14 = vld [vmem:[#allocation10 + $0x10] sm:$0xff]  ;;  %866 = vmatprep.mubr.msk.f32.mxu0 %vm112_vm1, %v95_v13  ;;  %v975_v16 = vpack.c.bf16 %v102_v9, %v101_v7 }
  0x5d   :  { %968 = vmatprep.subr.bf16.mxu0 %v967_v5  ;;  %v1369_v12 = vpack.c.bf16 %v198_v11, %v197_v10  ;;  %v200_v15 = vld [vmem:[#allocation10 + $0x18] sm:$0xff]  ;;  %v103_v17 = vld [vmem:[#allocation8 + $0x30] sm:$0xff]  ;;  %v201_v20 = vld [vmem:[#allocation10 + $0x20] sm:$0xff] }
  0x5e   :  { %970 = vmatpush3.bf16.msra.mxu0 %v967_v5  ;;  %v987_v18 = vpack.c.bf16 %v200_v15, %v199_v14  ;;  %v104_v19 = vld [vmem:[#allocation8 + $0x38] sm:$0xff]  ;;  %v202_v21 = vld [vmem:[#allocation10 + $0x28] sm:$0xff]  ;;  %v203_v24 = vld [vmem:[#allocation10 + $0x30] sm:$0xff] }
  0x5f   :  { %972 = vmatprep.subr.bf16.mxu0 %v971_v8  ;;  %985 = vmatpush3.bf16.msra.mxu1 %v1369_v12  ;;  %v979_v22 = vpack.c.bf16 %v104_v19, %v103_v17  ;;  %v990_v23 = vpack.c.bf16 %v202_v21, %v201_v20  ;;  %v204_v25 = vld [vmem:[#allocation10 + $0x38] sm:$0xff]  ;;  %v781_v28 = vld [vmem:[%s1439_s2] ss:$0 sm:$0xff]  ;;  %v567_v56 = vld [vmem:[#allocation13 + $0x8] sm:$0xff] }
  0x60   :  { %986 = vmatprep.subr.bf16.mxu1 %v1232_v0  ;;  %v993_v26 = vpack.c.bf16 %v204_v25, %v203_v24  ;;  %v96_v27 = vld [vmem:[#allocation5 + $0x8] sm:$0xff]  ;;  %v566_v55 = vld [vmem:[#allocation13] sm:$0xff]  ;;  %v568_v57 = vld [vmem:[#allocation13 + $0x10] sm:$0xff] }
  0x61   :  { %v1031_v58 = vpack.c.bf16 %v567_v56, %v566_v55  ;;  %v569_v59 = vld [vmem:[#allocation13 + $0x18] sm:$0xff]  ;;  %v562_v62 = vld [vmem:[#allocation11] sm:$0xff]  ;;  %v563_v63 = vld [vmem:[#allocation11 + $0x8] sm:$0xff] }
  0x62   :  { %974 = vmatpush3.bf16.msra.mxu0 %v971_v8  ;;  %v1035_v60 = vpack.c.bf16 %v569_v59, %v568_v57  ;;  %v564_v6 = vld [vmem:[#allocation11 + $0x10] sm:$0xff]  ;;  %v565_v7 = vld [vmem:[#allocation11 + $0x18] sm:$0xff]  ;;  %v791_v13 = vld [vmem:[%s1443_s6] ss:$0 sm:$0xff]  ;;  %s1236_s6 = smov [#allocation14]  }
  0x63   :  { %976 = vmatprep.subr.bf16.mxu0 %v975_v16  ;;  %988 = vmatpush3.bf16.msra.mxu1 %v987_v18  ;;  %v1043_v9 = vpack.c.bf16 %v565_v7, %v564_v6  ;;  %s767_s18 = sshll.u32 %s1236_s6, 4  ;;  %s768_s18 = int_to_ptr.vmem [resolvable:$true] %s767_s18 }
  0x64   :  { %989 = vmatprep.subr.bf16.mxu1 %v1232_v0  ;;  %s1195_s19 = scalar_lea.vmem %s768_s18, 256  ;;  %p1200_p13 = scmp.lt.s32.totalorder %s768_s18, %s768_s18 }
  0x65   :  { %p1196_p12 = scmp.ne.s32.totalorder %s768_s18, %s1195_s19  ;;  %p1201_p0 = scmp.lt.s32.totalorder %s1195_s19, %s1195_s19 }
  0x66   :  { %978 = vmatpush3.bf16.msra.mxu0 %v975_v16 }
  0x67   :  { %980 = vmatprep.subr.bf16.mxu0 %v979_v22  ;;  %991 = vmatpush3.bf16.msra.mxu1 %v990_v23  ;;  %p1202_p1 = por %p1201_p0, %p1200_p13 }
  0x68   :  { %992 = vmatprep.subr.bf16.mxu1 %v1232_v0 }
  0x69   :  { %p1203_p2 = pnand %p1202_p1, %p1196_p12 }
  0x6a   :  { %982 = vmatpush3.bf16.msra.mxu0 %v979_v22 }
  0x6b   :  { %994 = vmatpush3.bf16.msra.mxu1 %v993_v26  ;;  %995 = vmatprep.subr.bf16.mxu0 %v1232_v0 }
  0x6c   :  { %1007 = vmatprep.subr.bf16.mxu1 %v1232_v0 }
  0x6d   :  { %867 = vmatmul.mubr.msk.f32.vlgmr.msra.gmra.mrb[0].mxu0 %vm112_vm1, %v96_v27 }
  0x6e   :  { %886 = vmatmul.mubr.f32.vlgmr.msra.gmra.mrb[0].mxu1 %v1234_v1  ;;  %997 = vmatpush3.bf16.msra.mxu0 %v1369_v12 }
  0x6f   :  { %998 = vmatprep.subr.bf16.mxu0 %v1232_v0  ;;  %904 = vmatprep.mubr.msk.f32.mxu0 %vm1233_vm0, %v1234_v1 }
  0x70   :  { %1009 = vmatpush3.bf16.msra.mxu1 %v1369_v12  ;;  %923 = vmatprep.mubr.msk.f32.mxu1 %vm1233_vm0, %v1234_v1 }
  0x71   :  { %1010 = vmatprep.subr.bf16.mxu1 %v1232_v0 }
  0x72   :  { %1000 = vmatpush3.bf16.msra.mxu0 %v987_v18 }
  0x73   :  { %1001 = vmatprep.subr.bf16.mxu0 %v1232_v0 }
  0x74   :  { %1012 = vmatpush3.bf16.msra.mxu1 %v987_v18 }
  0x75   :  { %1013 = vmatprep.subr.bf16.mxu1 %v1232_v0 }
  0x76   :  { %1003 = vmatpush3.bf16.msra.mxu0 %v990_v23 }
  0x77   :  { %1004 = vmatprep.subr.bf16.mxu0 %v1232_v0 }
  0x78   :  { %1015 = vmatpush3.bf16.msra.mxu1 %v990_v23 }
  0x79   :  { %1016 = vmatprep.subr.bf16.mxu1 %v1232_v0 }
  0x7a   :  { %1006 = vmatpush3.bf16.msra.mxu0 %v993_v26 }
  0x7b   :  { %1019 = vmatprep.subr.bf16.mxu0 %v1232_v0 }
  0x7c   :  { %1018 = vmatpush3.bf16.msra.mxu1 %v993_v26 }
  0x7d   :  { %1032 = vmatprep.subr.bf16.mxu1 %v1031_v58 }
 0x140   :  { %v868_v29 = vpop.f32.mrb[0].mxu0 }
 0x141   :  { %v191_v30 = vadd.f32 %v868_v29, %v781_v28  ;;  %v185_v31 = vpop.f32.mrb[1].mxu0  ;;  %v274_v32 = vpop.f32.mrb[0].mxu1 }
 0x142   :  { %v186_v33 = vadd.f32 %v781_v28, %v185_v31  ;;  %v887_v34 = vpop.f32.mrb[1].mxu1 }
 0x143   :  { %195 = vst.msk [vmem:[#allocation2 + $0x8] sm:$0xff] %vm112_vm1, %v191_v30 }
 0x144   :  { %194 = vst.msk [vmem:[#allocation2] sm:$0xff] %vm112_vm1, %v186_v33 }
 0x14a   :  { %v376_v45 = vld [vmem:[#allocation2 + $0x8] sm:$0xf]  ;;  %v465_v51 = vld [vmem:[#allocation2 + $0xc] sm:$0xf] }
 0x14b   :  { %v196_v35 = vld [vmem:[#allocation2] sm:$0xf]  ;;  %v287_v39 = vld [vmem:[#allocation2 + $0x4] sm:$0xf] }
 0x14c   :  { %v278_v36 = vadd.f32 %v274_v32, %v196_v35 }
 0x14e   :  { %1061 = vtanh.f32 %v278_v36 }
 0x158   :  { %v1062_v37 = vpop.eup %1061 }
 0x159   :  { %283 = vrot.lane.b32.xlu1 %v1062_v37, %s1235_s27  ;;  %905 = vmatmul.mubr.msk.f32.vlgmr.msra.gmra.mrb[2].mxu0 %vm112_vm1, %v1062_v37  ;;  %281 = vst.msk [vmem:[#allocation3] sm:$0xf] %vm280_vm2, %v1062_v37 }
 0x15a   :  { %1021 = vmatpush3.bf16.msra.mxu0 %v1369_v12  ;;  %942 = vmatprep.mubr.msk.f32.mxu0 %vm1233_vm0, %v1234_v1 }
 0x15b   :  { %1022 = vmatprep.subr.bf16.mxu0 %v1232_v0 }
 0x15e   :  { %1024 = vmatpush3.bf16.msra.mxu0 %v987_v18 }
 0x15f   :  { %1025 = vmatprep.subr.bf16.mxu0 %v1232_v0 }
 0x162   :  { %1027 = vmatpush3.bf16.msra.mxu0 %v990_v23 }
 0x163   :  { %1028 = vmatprep.subr.bf16.mxu0 %v1232_v0  ;;  %v1039_v0 = vpack.c.bf16 %v563_v63, %v562_v62 }
 0x166   :  { %1030 = vmatpush3.bf16.msra.mxu0 %v993_v26 }
 0x1cb   :  { %v284_v38 = vpop.permute.xlu1 %283 }
 0x1cc   :  { %286 = vst.msk [vmem:[#allocation4 + $0xc] sm:$0xf] %vm280_vm2, %v284_v38 }
 0x22c   :  { %v364_v40 = vpop.f32.mrb[2].mxu0 }
 0x22d   :  { %v368_v41 = vadd.f32 %v364_v40, %v287_v39  ;;  %v906_v42 = vpop.f32.mrb[3].mxu0 }
 0x22f   :  { %1063 = vtanh.f32 %v368_v41 }
 0x239   :  { %v1064_v43 = vpop.eup %1063 }
 0x23a   :  { %370 = vst.msk [vmem:[#allocation3 + $0x4] sm:$0xf] %vm280_vm2, %v1064_v43  ;;  %372 = vrot.lane.b32.xlu1 %v1064_v43, %s1235_s27  ;;  %924 = vmatmul.mubr.msk.f32.vlgmr.msra.gmra.mrb[2].mxu1 %vm112_vm1, %v1064_v43 }
 0x23b   :  { %1034 = vmatpush3.bf16.msra.mxu1 %v1031_v58 }
 0x23c   :  { %1036 = vmatprep.subr.bf16.mxu1 %v1035_v60 }
 0x23f   :  { %1038 = vmatpush3.bf16.msra.mxu1 %v1035_v60 }
 0x240   :  { %1040 = vmatprep.subr.bf16.mxu1 %v1039_v0 }
 0x241   :  { %v554_v4 = vld [vmem:[#allocation3] sm:$0xff] }
 0x2ac   :  { %v373_v44 = vpop.permute.xlu1 %372 }
 0x2ad   :  { %375 = vst.msk [vmem:[#allocation4 + $0x8] sm:$0xf] %vm280_vm2, %v373_v44 }
 0x2b4   :  { %v559_v2 = vld [vmem:[#allocation4 + $0x8] sm:$0xff] }
 0x30d   :  { %v453_v46 = vpop.f32.mrb[2].mxu1 }
 0x30e   :  { %v457_v47 = vadd.f32 %v453_v46, %v376_v45  ;;  %v925_v48 = vpop.f32.mrb[3].mxu1 }
 0x310   :  { %1065 = vtanh.f32 %v457_v47 }
 0x31a   :  { %v1066_v49 = vpop.eup %1065 }
 0x31b   :  { %459 = vst.msk [vmem:[#allocation3 + $0x8] sm:$0xf] %vm280_vm2, %v1066_v49  ;;  %461 = vrot.lane.b32.xlu0 %v1066_v49, %s1235_s27  ;;  %943 = vmatmul.mubr.msk.f32.vlgmr.msra.gmra.mrb[4].mxu0 %vm112_vm1, %v1066_v49 }
 0x38d   :  { %v462_v50 = vpop.permute.xlu0 %461 }
 0x38e   :  { %464 = vst.msk [vmem:[#allocation4 + $0x4] sm:$0xf] %vm280_vm2, %v462_v50 }
 0x3ee   :  { %v542_v52 = vpop.f32.mrb[4].mxu0 }
 0x3ef   :  { %v546_v53 = vadd.f32 %v542_v52, %v465_v51  ;;  %v944_v54 = vpop.f32.mrb[5].mxu0 }
 0x3f1   :  { %1067 = vtanh.f32 %v546_v53 }
 0x3fb   :  { %v1068_v61 = vpop.eup %1067 }
 0x3fc   :  { %548 = vst.msk [vmem:[#allocation3 + $0xc] sm:$0xf] %vm280_vm2, %v1068_v61  ;;  %550 = vrot.lane.b32.xlu0 %v1068_v61, %s1235_s27 }
 0x403   :  { %v555_v5 = vld [vmem:[#allocation3 + $0x8] sm:$0xff] }
 0x46e   :  { %v551_v1 = vpop.permute.xlu0 %550 }
 0x46f   :  { %553 = vst.msk [vmem:[#allocation4] sm:$0xf] %vm280_vm2, %v551_v1 }
 0x476   :  { %v558_v3 = vld [vmem:[#allocation4] sm:$0xff] }
 0x477   :  { %1069 = vtanh.f32 %v558_v3 }
 0x478   :  { %1071 = vtanh.f32 %v559_v2 }
 0x479   :  { %1073 = vtanh.f32 %v554_v4 }
 0x47a   :  { %1075 = vtanh.f32 %v555_v5 }
 0x481   :  { %v1070_v8 = vpop.eup %1069 }
 0x482   :  { %v1072_v10 = vpop.eup %1071  ;;  %953 = vmatprep.mubr.msk.f32.mxu1 %vm570_vm3, %v1070_v8 }
 0x483   :  { %v1074_v11 = vpop.eup %1073  ;;  %954 = vmatmul.mubr.msk.f32.vlgmr.msra.gmra.mrb[4].mxu1 %vm570_vm3, %v1072_v10 }
 0x484   :  { %1042 = vmatpush3.bf16.msra.mxu1 %v1039_v0  ;;  %964 = vmatprep.mubr.msk.f32.mxu1 %vm570_vm3, %v1074_v11  ;;  %v1076_v12 = vpop.eup %1075 }
 0x485   :  { %1044 = vmatprep.subr.bf16.mxu1 %v1043_v9 }
 0x488   :  { %1046 = vmatpush3.bf16.msra.mxu1 %v1043_v9 }
 0x48b   :  { %965 = vmatmul.mubr.msk.f32.vlgmr.msra.gmra.mrb[4].mxu1 %vm570_vm3, %v1076_v12 }
 0x55e   :  { %v966_v14 = vpop.f32.mrb[4].mxu1 }
 0x55f   :  { %v741_v15 = vadd.f32 %v966_v14, %v791_v13  ;;  %v724_v16 = vpop.f32.mrb[5].mxu1 }
 0x560   :  { %v740_v17 = vadd.f32 %v791_v13, %v724_v16 }
 0x561   :  { %744 = vmax.xlane.f32.xlu1 %v741_v15 }
 0x562   :  { %742 = vmax.xlane.f32.xlu0 %v740_v17 }
 0x5ee   :  { %v745_v18 = vpop.xlane.xlu1 %744 }
 0x5ef   :  { %v743_v19 = vpop.xlane.xlu0 %742  ;;  %v747_v20 = vsub.f32 %v741_v15, %v745_v18 }
 0x5f0   :  { %v746_v21 = vsub.f32 %v740_v17, %v743_v19 }
 0x5f1   :  { %v750_v23 = vmul.f32 1.442695, %v747_v20 }
 0x5f2   :  { %v748_v22 = vmul.f32 1.442695, %v746_v21 }
 0x5f4   :  { %1077 = vpow2.f32 %v748_v22 }
 0x5f5   :  { %1079 = vpow2.f32 %v750_v23 }
 0x5fe   :  { %v1078_v24 = vpop.eup %1077 }
 0x5ff   :  { %752 = vadd.xlane.f32.xlu0 %v1078_v24  ;;  %v1080_v25 = vpop.eup %1079 }
 0x603   :  { %754 = vadd.xlane.f32.xlu0 %v1080_v25 }
 0x68c   :  { %v753_v26 = vpop.xlane.xlu0 %752 }
 0x68d   :  { %1081 = vrcp.f32 %v753_v26 }
 0x690   :  { %v755_v27 = vpop.xlane.xlu0 %754 }
 0x691   :  { %1083 = vrcp.f32 %v755_v27 }
 0x697   :  { %v1082_v28 = vpop.eup %1081 }
 0x698   :  { %v758_v29 = vmul.f32 %v1082_v28, %v1078_v24 }
 0x69a   :  { %760 = vst [vmem:[#allocation14] sm:$0xff] %v758_v29 }
 0x69b   :  { %v1084_v30 = vpop.eup %1083 }
 0x69c   :  { %v759_v31 = vmul.f32 %v1084_v30, %v1080_v25 }
 0x69e   :  { %761 = vst [vmem:[#allocation14 + $0x8] sm:$0xff] %v759_v31 }
 0x69f   :  { %1206 = shalt.err (!%p1203_p2)
}
 0x6a0   :  { %s1207_s22 = scalar_lea.hbm %s1444_s7, 256 }
 0x6a1   :  { %p1208_p3 = scmp.ne.s32.totalorder %s1444_s7, %s1207_s22  ;;  %p1211_p4 = scmp.lt.u32.totalorder %s1207_s22, %s1444_s7 }
 0x6a3   :  { %p1213_p5 = pnand %p1211_p4, %p1208_p3 }
 0x6a5   :  { %1216 = shalt.err (!%p1213_p5)
}
 0x6a6   :  { %773 = dma.vmem_to_hbm [thread:$0]  %s768_s18, 256, %s1444_s7, [#allocation7], %s1227_s13, %s1227_s13, %s1228_s14  }
 0x6a7   :  { %1223 = dma.done.wait [#allocation7], 256  }
 0x6a8   :  { %1224 = vsyncadd [#allocation7], 4294967040 }
 0x6a9   :  { %777 = vsyncpa [#allocation6], 1 }
 0x6aa   :  { %778 = vsyncpa [#allocation9], 1 }
 0x6ab   :  { %779 = vsyncpa [#allocation12], 1 }
 0x6ac   :  { %780 = vsyncpa [#allocation7], 1 }

</bundles_post_ra>
